<compile_context>
chip_gen: v7x
topology: tpu7x:2x2x1
jax: 0.10.0
libtpu: 0.0.40
codegen_flags: <defaults>
</compile_context>

<pallas_src>
import functools

import jax
import jax.numpy as jnp
from jax.experimental import pallas as pl
from jax.experimental.pallas import tpu as pltpu


def _gelu_tanh(x):
    # matches torch.nn.GELU(approximate='tanh')
    c = 0.7978845608028654  # sqrt(2/pi)
    return 0.5 * x * (1.0 + jnp.tanh(c * (x + 0.044715 * x * x * x)))


def deep_network_kernel(x_ref, w1_ref, b1_ref, w2_ref, b2_ref, out_ref):
    # x_ref:  [tile, d_in]      (batch tile, streamed per grid step)
    # w1_ref: [d_in, d_hidden]  (resident), b1_ref: [1, d_hidden]
    # w2_ref: [d_hidden, d_out] (resident), b2_ref: [1, d_out]
    # Matmuls accumulate in f32 regardless of the streamed dtype; GELU + bias
    # adds are done in f32 on the accumulated result.
    x = x_ref[...]
    h = jnp.dot(x, w1_ref[...], preferred_element_type=jnp.float32)
    h = _gelu_tanh(h + b1_ref[...].astype(jnp.float32))
    y = jnp.dot(h.astype(w2_ref.dtype), w2_ref[...],
                preferred_element_type=jnp.float32)
    y = y + b2_ref[...].astype(jnp.float32)
    out_ref[...] = y.astype(out_ref.dtype)


def _round_up(x, m):
    return (x + m - 1) // m * m


@functools.partial(jax.jit, static_argnames=("block_rows", "compute_dtype"))
def deep_network(x, params, *, block_rows=4096, compute_dtype=None):
    """Forward pass of DeepNetwork: fc2(gelu_tanh(fc1(x))).

    block_rows:    upper bound on the batch tile (rounded down to a multiple
                   of 8).  Default 4096 fits the default scoped VMEM on
                   v5e/v6e/v7x; raise it (with vmem_limit_bytes) on v7x.
    compute_dtype: optional dtype (e.g. jnp.bfloat16) for x/w1/w2 on the MXU.
                   For the full HBM-bandwidth win, store x and the weights in
                   bf16 upstream so no wrapper-side cast pass is needed.
    """
    w1, b1, w2, b2 = params["w1"], params["b1"], params["w2"], params["b2"]
    out_dtype = x.dtype

    if compute_dtype is not None:
        x = x.astype(compute_dtype)
        w1 = w1.astype(compute_dtype)
        w2 = w2.astype(compute_dtype)

    B, d_in = x.shape
    d_hidden = w1.shape[1]
    d_out = w2.shape[1]

    # Batch tile: multiple of 8 sublanes; guarantee >= 2 grid steps when
    # possible so megacore sharding + double-buffered pipelining engage.
    block_rows = max(8, (block_rows // 8) * 8)
    if B <= 8:
        tile = _round_up(B, 8)
    else:
        tile = min(block_rows, _round_up(pl.cdiv(B, 2), 8))

    grid = (pl.cdiv(B, tile),)  # ragged last block: no pad, no output slice

    out = pl.pallas_call(
        deep_network_kernel,
        out_shape=jax.ShapeDtypeStruct((B, d_out), out_dtype),
        grid_spec=pltpu.PrefetchScalarGridSpec(
            num_scalar_prefetch=0,
            grid=grid,
            in_specs=[
                # streamed batch tile
                pl.BlockSpec((tile, d_in), lambda i: (i, 0)),
                # weights / biases: constant block index -> resident in VMEM
                pl.BlockSpec((d_in, d_hidden), lambda i: (0, 0)),
                pl.BlockSpec((1, d_hidden), lambda i: (0, 0)),
                pl.BlockSpec((d_hidden, d_out), lambda i: (0, 0)),
                pl.BlockSpec((1, d_out), lambda i: (0, 0)),
            ],
            out_specs=pl.BlockSpec((tile, d_out), lambda i: (i, 0)),
        ),
        compiler_params=pltpu.CompilerParams(
            dimension_semantics=("parallel",),  # megacore sharding on v7x
        ),
    )(x, w1, b1, w2, b2)

    return out


def make_params(key, d_in, d_hidden, d_out):
    """Deterministic init matching torch.nn.Linear (uniform +/- 1/sqrt(fan_in))."""
    keys = jax.random.split(key, 4)

    def lin(kw, kb, fan_in, fan_out):
        bound = 1.0 / jnp.sqrt(fan_in)
        w = jax.random.uniform(kw, (fan_in, fan_out), jnp.float32, -bound, bound)
        b = jax.random.uniform(kb, (1, fan_out), jnp.float32, -bound, bound)
        return w, b

    w1, b1 = lin(keys[0], keys[1], d_in, d_hidden)   # fc1
    w2, b2 = lin(keys[2], keys[3], d_hidden, d_out)  # fc2
    return dict(w1=w1, b1=b1, w2=w2, b2=b2)


def deep_network_ref(x, p):
    """Pure-JAX reference mirroring the PyTorch forward, for validation."""
    h = _gelu_tanh(x @ p["w1"] + p["b1"])
    return h @ p["w2"] + p["b2"]


if __name__ == "__main__":
    key = jax.random.PRNGKey(0)
    k_x, k_p = jax.random.split(key)

    # Shapes consistent with the module's use in Location_Tower:
    # DeepNetwork(n_embd=32, hidden=4*n_embd=128, out=n_embd=32).
    B, D_IN, D_HIDDEN, D_OUT = 200, 32, 128, 32

    x = jax.random.normal(k_x, (B, D_IN), jnp.float32)
    params = make_params(k_p, D_IN, D_HIDDEN, D_OUT)

    ref = deep_network_ref(x, params)

    # f32 path. Default block_rows -> tile=104, grid=(2,): exercises megacore
    # split, resident weights, and the ragged (non-divisible) last block with
    # no wrapper pad/slice.
    out = jax.block_until_ready(deep_network(x, params))
    assert out.shape == (B, D_OUT)
    assert jnp.allclose(out, ref, rtol=1e-4, atol=1e-4), "f32 mismatch vs reference"

    # bf16 streaming path (halved activation/weight HBM traffic); accumulation
    # stays f32, so only a small numerical delta vs the f32 reference.
    out_bf16 = jax.block_until_ready(
        deep_network(x, params, compute_dtype=jnp.bfloat16))
    assert out_bf16.shape == (B, D_OUT)
    assert jnp.allclose(out_bf16.astype(jnp.float32), ref, rtol=5e-2, atol=5e-2), \
        "bf16 mismatch vs reference"

    print("KERNEL_OK")
</pallas_src>

<mosaic_0001>
module attributes {stable_mosaic.version = 11 : i64} {
  func.func @deep_network_kernel(%arg0: i32, %arg1: memref<104x32xf32, #tpu.memory_space<vmem>>, %arg2: memref<32x128xf32, #tpu.memory_space<vmem>>, %arg3: memref<1x128xf32, #tpu.memory_space<vmem>>, %arg4: memref<128x32xf32, #tpu.memory_space<vmem>>, %arg5: memref<1x32xf32, #tpu.memory_space<vmem>>, %arg6: memref<104x32xf32, #tpu.memory_space<vmem>>) attributes {dimension_semantics = [#tpu.dimension_semantics<parallel>], iteration_bounds = array<i64: 2>, scalar_prefetch = 0 : i64, scratch_operands = 0 : i64, tpu.core_type = #tpu.core_type<tc>, window_params = [{transform_indices = @transform_0, window_bounds = array<i64: 104, 32>}, {pipeline_mode = #tpu.pipeline_mode<synchronous>, transform_indices = @transform_1, window_bounds = array<i64: 32, 128>}, {pipeline_mode = #tpu.pipeline_mode<synchronous>, transform_indices = @transform_2, window_bounds = array<i64: 1, 128>}, {pipeline_mode = #tpu.pipeline_mode<synchronous>, transform_indices = @transform_3, window_bounds = array<i64: 128, 32>}, {pipeline_mode = #tpu.pipeline_mode<synchronous>, transform_indices = @transform_4, window_bounds = array<i64: 1, 32>}, {transform_indices = @transform_5, window_bounds = array<i64: 104, 32>}]} {
    %c0 = arith.constant 0 : index
    %c0_0 = arith.constant 0 : index
    %0 = vector.load %arg1[%c0, %c0_0] : memref<104x32xf32, #tpu.memory_space<vmem>>, vector<104x32xf32>
    %c0_1 = arith.constant 0 : index
    %c0_2 = arith.constant 0 : index
    %1 = vector.load %arg2[%c0_1, %c0_2] : memref<32x128xf32, #tpu.memory_space<vmem>>, vector<32x128xf32>
    %cst = arith.constant dense<0.000000e+00> : vector<104x128xf32>
    %2 = tpu.matmul %0, %1, %cst {dimension_numbers = #tpu.dot_dimension_numbers<[1], [0], [0], [1], [0, 0, 1, 1], [], []>} : vector<104x32xf32>, vector<32x128xf32>, vector<104x128xf32> -> vector<104x128xf32>
    %c0_3 = arith.constant 0 : index
    %c0_4 = arith.constant 0 : index
    %3 = vector.load %arg3[%c0_3, %c0_4] : memref<1x128xf32, #tpu.memory_space<vmem>>, vector<1x128xf32>
    %4 = vector.broadcast %3 : vector<1x128xf32> to vector<104x128xf32>
    %5 = arith.addf %2, %4 : vector<104x128xf32>
    %cst_5 = arith.constant 5.000000e-01 : f32
    %6 = vector.broadcast %cst_5 : f32 to vector<104x128xf32>
    %7 = arith.mulf %6, %5 : vector<104x128xf32>
    %cst_6 = arith.constant 4.471500e-02 : f32
    %8 = vector.broadcast %cst_6 : f32 to vector<104x128xf32>
    %9 = arith.mulf %8, %5 : vector<104x128xf32>
    %10 = arith.mulf %9, %5 : vector<104x128xf32>
    %11 = arith.mulf %10, %5 : vector<104x128xf32>
    %12 = arith.addf %5, %11 : vector<104x128xf32>
    %cst_7 = arith.constant 0.797884583 : f32
    %13 = vector.broadcast %cst_7 : f32 to vector<104x128xf32>
    %14 = arith.mulf %13, %12 : vector<104x128xf32>
    %15 = math.tanh %14 : vector<104x128xf32>
    %cst_8 = arith.constant 1.000000e+00 : f32
    %16 = vector.broadcast %cst_8 : f32 to vector<104x128xf32>
    %17 = arith.addf %16, %15 : vector<104x128xf32>
    %18 = arith.mulf %7, %17 : vector<104x128xf32>
    %c0_9 = arith.constant 0 : index
    %c0_10 = arith.constant 0 : index
    %19 = vector.load %arg4[%c0_9, %c0_10] : memref<128x32xf32, #tpu.memory_space<vmem>>, vector<128x32xf32>
    %cst_11 = arith.constant dense<0.000000e+00> : vector<104x32xf32>
    %20 = tpu.matmul %18, %19, %cst_11 {dimension_numbers = #tpu.dot_dimension_numbers<[1], [0], [0], [1], [0, 0, 1, 1], [], []>} : vector<104x128xf32>, vector<128x32xf32>, vector<104x32xf32> -> vector<104x32xf32>
    %c0_12 = arith.constant 0 : index
    %c0_13 = arith.constant 0 : index
    %21 = vector.load %arg5[%c0_12, %c0_13] : memref<1x32xf32, #tpu.memory_space<vmem>>, vector<1x32xf32>
    %22 = vector.broadcast %21 : vector<1x32xf32> to vector<104x32xf32>
    %23 = arith.addf %20, %22 : vector<104x32xf32>
    %c0_14 = arith.constant 0 : index
    %c0_15 = arith.constant 0 : index
    %24 = vector.load %arg6[%c0_14, %c0_15] : memref<104x32xf32, #tpu.memory_space<vmem>>, vector<104x32xf32>
    tpu.vector_store %arg6[%c0_14, %c0_15], %23 {strides = array<i32>} : memref<104x32xf32, #tpu.memory_space<vmem>>, vector<104x32xf32>,
    return
  }
  func.func @transform_0(%arg0: i32) -> (i32, i32) {
    %c0_i32 = arith.constant 0 : i32
    %c0_i32_0 = arith.constant 0 : i32
    return %arg0, %c0_i32 : i32, i32
  }
  func.func @transform_1(%arg0: i32) -> (i32, i32) {
    %c0_i32 = arith.constant 0 : i32
    %c0_i32_0 = arith.constant 0 : i32
    %c0_i32_1 = arith.constant 0 : i32
    return %c0_i32, %c0_i32_0 : i32, i32
  }
  func.func @transform_2(%arg0: i32) -> (i32, i32) {
    %c0_i32 = arith.constant 0 : i32
    %c0_i32_0 = arith.constant 0 : i32
    %c0_i32_1 = arith.constant 0 : i32
    return %c0_i32, %c0_i32_0 : i32, i32
  }
  func.func @transform_3(%arg0: i32) -> (i32, i32) {
    %c0_i32 = arith.constant 0 : i32
    %c0_i32_0 = arith.constant 0 : i32
    %c0_i32_1 = arith.constant 0 : i32
    return %c0_i32, %c0_i32_0 : i32, i32
  }
  func.func @transform_4(%arg0: i32) -> (i32, i32) {
    %c0_i32 = arith.constant 0 : i32
    %c0_i32_0 = arith.constant 0 : i32
    %c0_i32_1 = arith.constant 0 : i32
    return %c0_i32, %c0_i32_0 : i32, i32
  }
  func.func @transform_5(%arg0: i32) -> (i32, i32) {
    %c0_i32 = arith.constant 0 : i32
    %c0_i32_0 = arith.constant 0 : i32
    return %arg0, %c0_i32 : i32, i32
  }
}

</mosaic_0001>

<bundles_post_ra>
// kernel: deep_network.1
= control target key start
LH: loop header
LB: loop body
LE: loop exit
PB: predicated region body
PF: predicated region fallthrough
CT: control target
= control target key end

     0   :  { %s1475_s18 = smov 0   ;;  %s1477_s19 = smov 0   ;;  %s1865_s0 = inlined_call_operand.vmem [shape: f32[200,32], index: 0, kind: input, shape index: {}]   ;;  %s1866_s1 = inlined_call_operand.vmem [shape: f32[32,128], index: 1, kind: input, shape index: {}]   ;;  %s1867_s2 = inlined_call_operand.vmem [shape: f32[1,128], index: 2, kind: input, shape index: {}]   ;;  %s1868_s3 = inlined_call_operand.vmem [shape: f32[128,32], index: 3, kind: input, shape index: {}]   ;;  %s1869_s4 = inlined_call_operand.vmem [shape: f32[1,32], index: 4, kind: input, shape index: {}]   ;;  %s1870_s5 = inlined_call_operand.vmem [shape: f32[200,32], index: 5, kind: output, shape index: {}]  }
   0x1   :  { %s1479_s20 = smov 0  }
   0x2 LB: > { %s1488_s21 = sadd.s32 4294967295, %s1408_s20   ;;  %s1490_s22 = sadd.s32 1, %s1408_s20   ;;  %s1408_s20 = sphi %s1479_s20, %s1877_s20   ;;  %s1404_s19 = sphi %s1477_s19, %s1876_s19   ;;  %s1400_s18 = sphi %s1475_s18, %s1875_s18  }
   0x3   : > { %s129_s23 = ssub.s32 %s1408_s20, %s1490_s22  ;;  %s132_s24 = sadd.s32 1, %s1404_s19 }
   0x4   : > { %p130_p0 = scmp.eq.s32.totalorder %s129_s23, 0  ;;  %p142_p1 = scmp.ne.s32.totalorder %s1404_s19, %s1400_s18 }
   0x5   : > { %p143_p2 = scmp.eq.s32.totalorder %s1488_s21, 1  ;;  %p991_p3 = scmp.ge.s32.totalorder %s1408_s20, 1 }
   0x6   : > { %s1498_s25 = scalar_select %p130_p0, %s1404_s19, %s132_s24  }
   0x7   : > { %p1500_p4 = por %p143_p2, %p142_p1  ;;  %p196_p5 = scmp.lt.s32.totalorder %s1408_s20, 3 }
   0x9   : > { %p197_p6 = pnand %p991_p3, %p196_p5 }
   0xa   : > { %v259_v0 = vld [vmem:[%s1866_s1] sm:$0xff] (!%p197_p6)  ;;  %v260_v1 = vld [vmem:[%s1866_s1 + $0x8] sm:$0xff] (!%p197_p6)  ;;  %v261_v2 = vld [vmem:[%s1866_s1 + $0x10] sm:$0xff] (!%p197_p6)  ;;  %v1442_v3 = vmov (!%p197_p6), 0.0|0.0   ;;  %vm1443_vm0 = vmmov (!%p197_p6), 0   ;;  %v1444_v6 = vmov (!%p197_p6), 0.0  }
   0xb   : > { %200 = sbr.rel (%p197_p6) target bundleno = 586 (0x24a), region = 40  ;;  %1185 = vmatprep.subr.bf16.mxu0 (!%p197_p6), %v1442_v3  ;;  %v1186_v4 = vpack.c.bf16 (!%p197_p6), %v260_v1, %v259_v0  ;;  %v262_v5 = vld [vmem:[%s1866_s1 + $0x18] sm:$0xff] (!%p197_p6)  ;;  %1075 = vmatprep.mubr.msk.f32.mxu0 (!%p197_p6), %vm1443_vm0, %v1444_v6  ;;  %v557_v7 = vld [vmem:[%s1868_s3] sm:$0xff] (!%p197_p6)  ;;  %v558_v8 = vld [vmem:[%s1868_s3 + $0x8] sm:$0xff] (!%p197_p6)  ;;  %vm270_vm1 = vcmask (!%p197_p6), 261120   ;;  %s224_s14 = sand.u32 (!%p197_p6), 1, %s1400_s18  }
   0xc   : > { %s1520_s10 = smul.u32 (!%p197_p6), 13, %s1488_s21  ;;  %v1192_v9 = vpack.c.bf16 (!%p197_p6), %v558_v8, %v557_v7  ;;  %1215 = vmatprep.subr.bf16.mxu1 (!%p197_p6), %v1442_v3  ;;  %1155 = vmatprep.mubr.msk.f32.mxu1 (!%p197_p6), %vm1443_vm0, %v1444_v6  ;;  %v1189_v10 = vpack.c.bf16 (!%p197_p6), %v262_v5, %v261_v2  ;;  %v559_v24 = vld [vmem:[%s1868_s3 + $0x10] sm:$0xff] (!%p197_p6)  ;;  %v560_v25 = vld [vmem:[%s1868_s3 + $0x18] sm:$0xff] (!%p197_p6)  ;;  %v561_v27 = vld [vmem:[%s1868_s3 + $0x20] sm:$0xff] (!%p197_p6) }
   0xd   : > { %1187 = vmatpush3.bf16.msra.mxu0 (!%p197_p6), %v1186_v4  ;;  %v1195_v26 = vpack.c.bf16 (!%p197_p6), %v560_v25, %v559_v24  ;;  %v562_v28 = vld [vmem:[%s1868_s3 + $0x28] sm:$0xff] (!%p197_p6)  ;;  %v563_v30 = vld [vmem:[%s1868_s3 + $0x30] sm:$0xff] (!%p197_p6)  ;;  %v564_v31 = vld [vmem:[%s1868_s3 + $0x38] sm:$0xff] (!%p197_p6) }
   0xe   : > { %p232_p7 = scmp.lt.s32.totalorder (!%p197_p6), %s1520_s10, 24  ;;  %1188 = vmatprep.subr.bf16.mxu0 (!%p197_p6), %v1442_v3  ;;  %1223 = vmatpush3.bf16.msra.mxu1 (!%p197_p6), %v1192_v9  ;;  %v1198_v29 = vpack.c.bf16 (!%p197_p6), %v562_v28, %v561_v27  ;;  %v1201_v32 = vpack.c.bf16 (!%p197_p6), %v564_v31, %v563_v30  ;;  %v565_v33 = vld [vmem:[%s1868_s3 + $0x40] sm:$0xff] (!%p197_p6)  ;;  %v566_v34 = vld [vmem:[%s1868_s3 + $0x48] sm:$0xff] (!%p197_p6)  ;;  %v567_v36 = vld [vmem:[%s1868_s3 + $0x50] sm:$0xff] (!%p197_p6) }
   0xf   : > { %1216 = vmatprep.subr.bf16.mxu1 (!%p197_p6), %v1442_v3  ;;  %v1204_v35 = vpack.c.bf16 (!%p197_p6), %v566_v34, %v565_v33  ;;  %v568_v37 = vld [vmem:[%s1868_s3 + $0x58] sm:$0xff] (!%p197_p6)  ;;  %v569_v39 = vld [vmem:[%s1868_s3 + $0x60] sm:$0xff] (!%p197_p6)  ;;  %v570_v40 = vld [vmem:[%s1868_s3 + $0x68] sm:$0xff] (!%p197_p6) }
  0x10   : > { %v1207_v38 = vpack.c.bf16 (!%p197_p6), %v568_v37, %v567_v36  ;;  %v1210_v41 = vpack.c.bf16 (!%p197_p6), %v570_v40, %v569_v39  ;;  %v571_v42 = vld [vmem:[%s1868_s3 + $0x70] sm:$0xff] (!%p197_p6)  ;;  %v572_v43 = vld [vmem:[%s1868_s3 + $0x78] sm:$0xff] (!%p197_p6)  ;;  %v1651_v45 = vld [vmem:[%s1867_s2] ss:$0 sm:$0xff] (!%p197_p6) }
  0x11   : > { %1190 = vmatpush3.bf16.msra.mxu0 (!%p197_p6), %v1189_v10  ;;  %v1213_v44 = vpack.c.bf16 (!%p197_p6), %v572_v43, %v571_v42 }
  0x12   : > { %s233_s15 = scalar_select %p232_p7, %s1520_s10, 24  ;;  %1191 = vmatprep.subr.bf16.mxu0 %v1442_v3  ;;  %1224 = vmatpush3.bf16.msra.mxu1 %v1195_v26 }
  0x13   : > { %1217 = vmatprep.subr.bf16.mxu1 %v1442_v3  ;;  %s731_s18 = ssub.s32 (%p1500_p4), 25, %s1520_s10 }
  0x14   : > { %s992_s16 = sshll.u32 %s233_s15, 3  ;;  %s1231_s15 = smul.u32 104, %s224_s14 }
  0x15   : > { %s1538_s23 = scalar_lea.vmem %s1865_s0, %s992_s16  ;;  %p732_p8 = scmp.lt.s32.totalorder (%p1500_p4), %s731_s18, 13 }
  0x16   : > { %v246_v11 = vld [vmem:[%s1538_s23] sm:$0xff]  ;;  %v247_v12 = vld [vmem:[%s1538_s23 + $0x8] sm:$0xff]  ;;  %v248_v13 = vld [vmem:[%s1538_s23 + $0x10] sm:$0xff]  ;;  %1225 = vmatpush3.bf16.msra.mxu1 %v1198_v29  ;;  %s1748_s20 = scalar_lea.vmem [#allocation2], %s1231_s15  }
  0x17   : > { %1076 = vmatmul.mubr.msk.f32.vlgmr.msra.gmra.mrb[0].mxu0 %vm270_vm1, %v246_v11  ;;  %v249_v14 = vld [vmem:[%s1538_s23 + $0x18] sm:$0xff]  ;;  %v250_v15 = vld [vmem:[%s1538_s23 + $0x20] sm:$0xff]  ;;  %v251_v16 = vld [vmem:[%s1538_s23 + $0x28] sm:$0xff]  ;;  %1218 = vmatprep.subr.bf16.mxu1 %v1442_v3 }
  0x18   : > { %1078 = vmatprep.mubr.msk.f32.mxu0 %vm1443_vm0, %v1444_v6  ;;  %1193 = vmatpush3.bf16.msra.mxu0 %v1192_v9  ;;  %v252_v17 = vld [vmem:[%s1538_s23 + $0x30] sm:$0xff]  ;;  %v253_v18 = vld [vmem:[%s1538_s23 + $0x38] sm:$0xff]  ;;  %v254_v19 = vld [vmem:[%s1538_s23 + $0x40] sm:$0xff] }
  0x19   : > { %1194 = vmatprep.subr.bf16.mxu0 %v1442_v3  ;;  %v255_v20 = vld [vmem:[%s1538_s23 + $0x48] sm:$0xff]  ;;  %v256_v21 = vld [vmem:[%s1538_s23 + $0x50] sm:$0xff]  ;;  %v257_v22 = vld [vmem:[%s1538_s23 + $0x58] sm:$0xff] }
  0x1a   : > { %v258_v23 = vld [vmem:[%s1538_s23 + $0x60] sm:$0xff]  ;;  %1226 = vmatpush3.bf16.msra.mxu1 %v1201_v32  ;;  %s1020_s23 = smul.u32 (%p1500_p4), 104, %s1488_s21 }
  0x1b   : > { %1079 = vmatmul.mubr.msk.f32.gmra.mrb[2].mxu0 %vm270_vm1, %v247_v12  ;;  %1219 = vmatprep.subr.bf16.mxu1 %v1442_v3 }
  0x1c   : > { %1081 = vmatprep.mubr.msk.f32.mxu0 %vm1443_vm0, %v1444_v6  ;;  %1196 = vmatpush3.bf16.msra.mxu0 %v1195_v26  ;;  %s1783_s28 = scalar_lea.vmem (%p1500_p4), %s1870_s5, %s1020_s23  }
  0x1d   : > { %1197 = vmatprep.subr.bf16.mxu0 %v1442_v3 }
  0x1e   : > { %1227 = vmatpush3.bf16.msra.mxu1 %v1204_v35 }
  0x1f   : > { %1082 = vmatmul.mubr.msk.f32.gmra.mrb[4].mxu0 %vm270_vm1, %v248_v13  ;;  %1220 = vmatprep.subr.bf16.mxu1 %v1442_v3 }
  0x20   : > { %1084 = vmatprep.mubr.msk.f32.mxu0 %vm1443_vm0, %v1444_v6  ;;  %1199 = vmatpush3.bf16.msra.mxu0 %v1198_v29 }
  0x21   : > { %1200 = vmatprep.subr.bf16.mxu0 %v1442_v3 }
  0x22   : > { %1228 = vmatpush3.bf16.msra.mxu1 %v1207_v38 }
  0x23   : > { %1085 = vmatmul.mubr.msk.f32.gmra.mrb[6].mxu0 %vm270_vm1, %v249_v14  ;;  %1221 = vmatprep.subr.bf16.mxu1 %v1442_v3 }
  0x24   : > { %1087 = vmatprep.mubr.msk.f32.mxu0 %vm1443_vm0, %v1444_v6  ;;  %1202 = vmatpush3.bf16.msra.mxu0 %v1201_v32 }
  0x25   : > { %1203 = vmatprep.subr.bf16.mxu0 %v1442_v3 }
  0x26   : > { %1229 = vmatpush3.bf16.msra.mxu1 %v1210_v41 }
  0x27   : > { %1088 = vmatmul.mubr.msk.f32.gmra.mrb[8].mxu0 %vm270_vm1, %v250_v15  ;;  %1222 = vmatprep.subr.bf16.mxu1 %v1442_v3 }
  0x28   : > { %1090 = vmatprep.mubr.msk.f32.mxu0 %vm1443_vm0, %v1444_v6  ;;  %1205 = vmatpush3.bf16.msra.mxu0 %v1204_v35 }
  0x29   : > { %1206 = vmatprep.subr.bf16.mxu0 %v1442_v3 }
  0x2a   : > { %1230 = vmatpush3.bf16.msra.mxu1 %v1213_v44 }
  0x2b   : > { %1091 = vmatmul.mubr.msk.f32.gmra.mrb[10].mxu0 %vm270_vm1, %v251_v16 }
  0x2c   : > { %1093 = vmatprep.mubr.msk.f32.mxu0 %vm1443_vm0, %v1444_v6  ;;  %1208 = vmatpush3.bf16.msra.mxu0 %v1207_v38 }
  0x2d   : > { %1209 = vmatprep.subr.bf16.mxu0 %v1442_v3 }
  0x2f   : > { %1094 = vmatmul.mubr.msk.f32.gmra.mrb[12].mxu0 %vm270_vm1, %v252_v17 }
  0x30   : > { %1096 = vmatprep.mubr.msk.f32.mxu0 %vm1443_vm0, %v1444_v6  ;;  %1211 = vmatpush3.bf16.msra.mxu0 %v1210_v41 }
  0x31   : > { %1212 = vmatprep.subr.bf16.mxu0 %v1442_v3 }
  0x33   : > { %1097 = vmatmul.mubr.msk.f32.gmra.mrb[14].mxu0 %vm270_vm1, %v253_v18 }
  0x34   : > { %1099 = vmatprep.mubr.msk.f32.mxu0 %vm1443_vm0, %v1444_v6  ;;  %1214 = vmatpush3.bf16.msra.mxu0 %v1213_v44 }
  0x37   : > { %1100 = vmatmul.mubr.msk.f32.gmra.mrb[16].mxu0 %vm270_vm1, %v254_v19 }
  0x38   : > { %1102 = vmatprep.mubr.msk.f32.mxu0 %vm1443_vm0, %v1444_v6 }
  0x3b   : > { %1103 = vmatmul.mubr.msk.f32.gmra.mrb[18].mxu0 %vm270_vm1, %v255_v20 }
  0x3c   : > { %1105 = vmatprep.mubr.msk.f32.mxu0 %vm1443_vm0, %v1444_v6 }
  0x3f   : > { %1106 = vmatmul.mubr.msk.f32.gmra.mrb[20].mxu0 %vm270_vm1, %v256_v21 }
  0x40   : > { %1108 = vmatprep.mubr.msk.f32.mxu0 %vm1443_vm0, %v1444_v6 }
  0x43   : > { %1109 = vmatmul.mubr.msk.f32.gmra.mrb[22].mxu0 %vm270_vm1, %v257_v22 }
  0x44   : > { %1111 = vmatprep.mubr.msk.f32.mxu0 %vm1443_vm0, %v1444_v6 }
  0x47   : > { %1112 = vmatmul.mubr.msk.f32.gmra.mrb[24].mxu0 %vm270_vm1, %v258_v23 }
  0x48   : > { %1146 = vmatprep.mubr.msk.f32.mxu0 %vm1443_vm0, %v1444_v6 }
  0xea   : > { %v376_v46 = vpop.f32.mrb[0].mxu0 }
  0xeb   : > { %v377_v47 = vadd.f32 %v1651_v45, %v376_v46  ;;  %v1077_v48 = vpop.f32.mrb[1].mxu0 }
  0xed   : > { %v453_v49 = vmul.f32 0.044715, %v377_v47  ;;  %v440_v26 = vmul.f32 0.5, %v377_v47 }
  0xee   : > { %v381_v50 = vpop.f32.mrb[2].mxu0 }
  0xef   : > { %v466_v51 = vmul.f32 %v453_v49, %v377_v47  ;;  %v382_v52 = vadd.f32 %v1651_v45, %v381_v50  ;;  %v1080_v53 = vpop.f32.mrb[3].mxu0 }
  0xf1   : > { %v479_v54 = vmul.f32 %v466_v51, %v377_v47  ;;  %v454_v55 = vmul.f32 0.044715, %v382_v52  ;;  %v441_v39 = vmul.f32 0.5, %v382_v52 }
  0xf2   : > { %v386_v56 = vpop.f32.mrb[4].mxu0 }
  0xf3   : > { %v492_v57 = vadd.f32 %v479_v54, %v377_v47  ;;  %v467_v58 = vmul.f32 %v454_v55, %v382_v52  ;;  %v387_v59 = vadd.f32 %v1651_v45, %v386_v56  ;;  %v1083_v60 = vpop.f32.mrb[5].mxu0 }
  0xf5   : > { %v505_v61 = vmul.f32 0.7978846, %v492_v57  ;;  %v455_v62 = vmul.f32 0.044715, %v387_v59  ;;  %v480_v63 = vmul.f32 %v467_v58, %v382_v52 }
  0xf6   : > { %v391_v0 = vpop.f32.mrb[6].mxu0 }
  0xf7   : > { %1324 = vtanh.f32 %v505_v61  ;;  %v468_v1 = vmul.f32 %v455_v62, %v387_v59  ;;  %v1657_v2 = vadd.f32 %v1651_v45, %v391_v0  ;;  %v1086_v3 = vpop.f32.mrb[7].mxu0  ;;  %v493_v4 = vadd.f32 %v480_v63, %v382_v52 }
  0xf8   : > { %v442_v52 = vmul.f32 0.5, %v387_v59 }
  0xf9   : > { %v456_v5 = vmul.f32 0.044715, %v1657_v2  ;;  %v506_v7 = vmul.f32 0.7978846, %v493_v4  ;;  %v481_v8 = vmul.f32 %v468_v1, %v387_v59  ;;  %v443_v0 = vmul.f32 0.5, %v1657_v2 }
  0xfa   : > { %v396_v9 = vpop.f32.mrb[8].mxu0 }
  0xfb   : > { %v469_v10 = vmul.f32 %v456_v5, %v1657_v2  ;;  %v1662_v11 = vadd.f32 %v1651_v45, %v396_v9  ;;  %v1089_v12 = vpop.f32.mrb[9].mxu0  ;;  %1326 = vtanh.f32 %v506_v7  ;;  %v494_v13 = vadd.f32 %v481_v8, %v387_v59 }
  0xfd   : > { %v457_v14 = vmul.f32 0.044715, %v1662_v11  ;;  %v507_v15 = vmul.f32 0.7978846, %v494_v13  ;;  %v482_v16 = vmul.f32 %v469_v10, %v1657_v2 }
  0xfe   : > { %v401_v17 = vpop.f32.mrb[10].mxu0 }
  0xff   : > { %v470_v18 = vmul.f32 %v457_v14, %v1662_v11  ;;  %v1668_v19 = vadd.f32 %v1651_v45, %v401_v17  ;;  %v1092_v20 = vpop.f32.mrb[11].mxu0  ;;  %1328 = vtanh.f32 %v507_v15  ;;  %v495_v21 = vadd.f32 %v482_v16, %v1657_v2 }
 0x100   : > { %v444_v2 = vmul.f32 0.5, %v1662_v11 }
 0x101   : > { %v1325_v22 = vpop.eup %1324  ;;  %v458_v23 = vmul.f32 0.044715, %v1668_v19  ;;  %v508_v24 = vmul.f32 0.7978846, %v495_v21  ;;  %v483_v25 = vmul.f32 %v470_v18, %v1662_v11 }
 0x102   : > { %v406_v27 = vpop.f32.mrb[12].mxu0  ;;  %v531_v28 = vadd.f32 1.0, %v1325_v22 }
 0x103   : > { %v471_v29 = vmul.f32 %v458_v23, %v1668_v19  ;;  %v1675_v30 = vadd.f32 %v1651_v45, %v406_v27  ;;  %v1095_v31 = vpop.f32.mrb[13].mxu0  ;;  %1330 = vtanh.f32 %v508_v24  ;;  %v496_v32 = vadd.f32 %v483_v25, %v1662_v11 }
 0x104   : > { %v544_v33 = vmul.f32 %v531_v28, %v440_v26  ;;  %v445_v26 = vmul.f32 0.5, %v1668_v19 }
 0x105   : > { %v1327_v34 = vpop.eup %1326  ;;  %v459_v35 = vmul.f32 0.044715, %v1675_v30  ;;  %v509_v36 = vmul.f32 0.7978846, %v496_v32  ;;  %v484_v37 = vmul.f32 %v471_v29, %v1668_v19 }
 0x106   : > { %v411_v38 = vpop.f32.mrb[14].mxu0  ;;  %1147 = vmatmul.mubr.f32.vlgmr.msra.gmra.mrb[26].mxu0 %v544_v33  ;;  %v532_v40 = vadd.f32 1.0, %v1327_v34 }
 0x107   : > { %v472_v41 = vmul.f32 %v459_v35, %v1675_v30  ;;  %v1682_v42 = vadd.f32 %v1651_v45, %v411_v38  ;;  %v1098_v43 = vpop.f32.mrb[15].mxu0  ;;  %1149 = vmatprep.mubr.msk.f32.mxu0 %vm1443_vm0, %v1444_v6  ;;  %1332 = vtanh.f32 %v509_v36  ;;  %v497_v44 = vadd.f32 %v484_v37, %v1668_v19 }
 0x108   : > { %v545_v46 = vmul.f32 %v532_v40, %v441_v39  ;;  %v446_v19 = vmul.f32 0.5, %v1675_v30 }
 0x109   : > { %v1329_v47 = vpop.eup %1328  ;;  %v460_v48 = vmul.f32 0.044715, %v1682_v42  ;;  %v510_v49 = vmul.f32 0.7978846, %v497_v44  ;;  %v485_v50 = vmul.f32 %v472_v41, %v1675_v30 }
 0x10a   : > { %v416_v51 = vpop.f32.mrb[16].mxu0  ;;  %1150 = vmatmul.mubr.f32.gmra.mrb[28].mxu0 %v545_v46  ;;  %v533_v53 = vadd.f32 1.0, %v1329_v47 }
 0x10b   : > { %v473_v54 = vmul.f32 %v460_v48, %v1682_v42  ;;  %v1691_v55 = vadd.f32 %v1651_v45, %v416_v51  ;;  %v1101_v56 = vpop.f32.mrb[17].mxu0  ;;  %1152 = vmatprep.mubr.msk.f32.mxu0 %vm1443_vm0, %v1444_v6  ;;  %1334 = vtanh.f32 %v510_v49  ;;  %v498_v57 = vadd.f32 %v485_v50, %v1675_v30 }
 0x10c   : > { %v546_v58 = vmul.f32 %v533_v53, %v442_v52  ;;  %v447_v51 = vmul.f32 0.5, %v1682_v42 }
 0x10d   : > { %v1331_v60 = vpop.eup %1330  ;;  %v461_v61 = vmul.f32 0.044715, %v1691_v55  ;;  %v511_v62 = vmul.f32 0.7978846, %v498_v57  ;;  %v486_v59 = vmul.f32 %v473_v54, %v1682_v42 }
 0x10e   : > { %v421_v63 = vpop.f32.mrb[18].mxu0  ;;  %1153 = vmatmul.mubr.f32.gmra.mrb[30].mxu0 %v546_v58  ;;  %v534_v1 = vadd.f32 1.0, %v1331_v60  ;;  %v448_v58 = vmul.f32 0.5, %v1691_v55 }
 0x10f   : > { %v474_v3 = vmul.f32 %v461_v61, %v1691_v55  ;;  %v1701_v4 = vadd.f32 %v1651_v45, %v421_v63  ;;  %v1104_v5 = vpop.f32.mrb[19].mxu0  ;;  %1336 = vtanh.f32 %v511_v62  ;;  %v499_v7 = vadd.f32 %v486_v59, %v1682_v42 }
 0x110   : > { %v547_v8 = vmul.f32 %v534_v1, %v443_v0 }
 0x111   : > { %v1333_v9 = vpop.eup %1332  ;;  %v462_v10 = vmul.f32 0.044715, %v1701_v4  ;;  %v512_v12 = vmul.f32 0.7978846, %v499_v7  ;;  %v487_v13 = vmul.f32 %v474_v3, %v1691_v55  ;;  %v449_v63 = vmul.f32 0.5, %v1701_v4 }
 0x112   : > { %v426_v14 = vpop.f32.mrb[20].mxu0  ;;  %1156 = vmatmul.mubr.f32.vlgmr.msra.gmra.mrb[0].mxu1 %v547_v8  ;;  %v535_v15 = vadd.f32 1.0, %v1333_v9 }
 0x113   : > { %v475_v16 = vmul.f32 %v462_v10, %v1701_v4  ;;  %v1709_v17 = vadd.f32 %v1651_v45, %v426_v14  ;;  %v1107_v18 = vpop.f32.mrb[21].mxu0  ;;  %1158 = vmatprep.mubr.msk.f32.mxu1 %vm1443_vm0, %v1444_v6  ;;  %1338 = vtanh.f32 %v512_v12  ;;  %v500_v20 = vadd.f32 %v487_v13, %v1691_v55 }
 0x114   : > { %v548_v21 = vmul.f32 %v535_v15, %v444_v2  ;;  %v1007_v15 = vld [vmem:[%s1869_s4] ss:$0 sm:$0xff] }
 0x115   : > { %v1335_v22 = vpop.eup %1334  ;;  %v463_v23 = vmul.f32 0.044715, %v1709_v17  ;;  %v513_v24 = vmul.f32 0.7978846, %v500_v20  ;;  %v488_v11 = vmul.f32 %v475_v16, %v1701_v4  ;;  %v450_v55 = vmul.f32 0.5, %v1709_v17 }
 0x116   : > { %v431_v25 = vpop.f32.mrb[22].mxu0  ;;  %1159 = vmatmul.mubr.f32.gmra.mrb[2].mxu1 %v548_v21  ;;  %v536_v27 = vadd.f32 1.0, %v1335_v22 }
 0x117   : > { %v476_v28 = vmul.f32 %v463_v23, %v1709_v17  ;;  %v432_v29 = vadd.f32 %v1651_v45, %v431_v25  ;;  %v1110_v31 = vpop.f32.mrb[23].mxu0  ;;  %1161 = vmatprep.mubr.msk.f32.mxu1 %vm1443_vm0, %v1444_v6  ;;  %1340 = vtanh.f32 %v513_v24  ;;  %v501_v32 = vadd.f32 %v488_v11, %v1701_v4 }
 0x118   : > { %v549_v33 = vmul.f32 %v536_v27, %v445_v26 }
 0x119   : > { %v1337_v34 = vpop.eup %1336  ;;  %v464_v35 = vmul.f32 0.044715, %v432_v29  ;;  %v514_v36 = vmul.f32 0.7978846, %v501_v32  ;;  %v489_v37 = vmul.f32 %v476_v28, %v1709_v17  ;;  %v451_v9 = vmul.f32 0.5, %v432_v29 }
 0x11a   : > { %v436_v38 = vpop.f32.mrb[24].mxu0  ;;  %1162 = vmatmul.mubr.f32.gmra.mrb[4].mxu1 %v549_v33  ;;  %v537_v39 = vadd.f32 1.0, %v1337_v34 }
 0x11b   : > { %v477_v40 = vmul.f32 %v464_v35, %v432_v29  ;;  %v437_v41 = vadd.f32 %v1651_v45, %v436_v38  ;;  %v1113_v43 = vpop.f32.mrb[25].mxu0  ;;  %1164 = vmatprep.mubr.msk.f32.mxu1 %vm1443_vm0, %v1444_v6  ;;  %1342 = vtanh.f32 %v514_v36  ;;  %v502_v44 = vadd.f32 %v489_v37, %v1709_v17 }
 0x11c   : > { %v550_v46 = vmul.f32 %v537_v39, %v446_v19 }
 0x11d   : > { %v1339_v47 = vpop.eup %1338  ;;  %v465_v48 = vmul.f32 0.044715, %v437_v41  ;;  %v515_v49 = vmul.f32 0.7978846, %v502_v44  ;;  %v490_v50 = vmul.f32 %v477_v40, %v432_v29  ;;  %v452_v13 = vmul.f32 0.5, %v437_v41 }
 0x11e   : > { %1165 = vmatmul.mubr.f32.gmra.mrb[6].mxu1 %v550_v46  ;;  %v538_v30 = vadd.f32 1.0, %v1339_v47 }
 0x11f   : > { %v478_v52 = vmul.f32 %v465_v48, %v437_v41  ;;  %1167 = vmatprep.mubr.msk.f32.mxu1 %vm1443_vm0, %v1444_v6  ;;  %1344 = vtanh.f32 %v515_v49  ;;  %v503_v45 = vadd.f32 %v490_v50, %v432_v29 }
 0x120   : > { %v551_v53 = vmul.f32 %v538_v30, %v447_v51 }
 0x121   : > { %v1341_v54 = vpop.eup %1340  ;;  %v516_v56 = vmul.f32 0.7978846, %v503_v45  ;;  %v491_v57 = vmul.f32 %v478_v52, %v437_v41 }
 0x122   : > { %1168 = vmatmul.mubr.f32.gmra.mrb[8].mxu1 %v551_v53  ;;  %v539_v60 = vadd.f32 1.0, %v1341_v54 }
 0x123   : > { %1170 = vmatprep.mubr.msk.f32.mxu1 %vm1443_vm0, %v1444_v6  ;;  %1346 = vtanh.f32 %v516_v56  ;;  %v504_v42 = vadd.f32 %v491_v57, %v437_v41 }
 0x124   : > { %v552_v61 = vmul.f32 %v539_v60, %v448_v58 }
 0x125   : > { %v1343_v62 = vpop.eup %1342  ;;  %v517_v59 = vmul.f32 0.7978846, %v504_v42 }
 0x126   : > { %1171 = vmatmul.mubr.f32.gmra.mrb[10].mxu1 %v552_v61  ;;  %v540_v0 = vadd.f32 1.0, %v1343_v62 }
 0x127   : > { %1173 = vmatprep.mubr.msk.f32.mxu1 %vm1443_vm0, %v1444_v6  ;;  %1348 = vtanh.f32 %v517_v59 }
 0x128   : > { %v553_v1 = vmul.f32 %v540_v0, %v449_v63 }
 0x129   : > { %v1345_v3 = vpop.eup %1344 }
 0x12a   : > { %1174 = vmatmul.mubr.f32.gmra.mrb[12].mxu1 %v553_v1  ;;  %v541_v5 = vadd.f32 1.0, %v1345_v3 }
 0x12b   : > { %1176 = vmatprep.mubr.msk.f32.mxu1 %vm1443_vm0, %v1444_v6 }
 0x12c   : > { %v554_v7 = vmul.f32 %v541_v5, %v450_v55 }
 0x12d   : > { %v1347_v8 = vpop.eup %1346 }
 0x12e   : > { %1177 = vmatmul.mubr.f32.gmra.mrb[14].mxu1 %v554_v7  ;;  %v542_v4 = vadd.f32 1.0, %v1347_v8 }
 0x12f   : > { %1179 = vmatprep.mubr.msk.f32.mxu1 %vm1443_vm0, %v1444_v6 }
 0x130   : > { %v555_v10 = vmul.f32 %v542_v4, %v451_v9 }
 0x131   : > { %v1349_v12 = vpop.eup %1348 }
 0x132   : > { %1180 = vmatmul.mubr.f32.gmra.mrb[16].mxu1 %v555_v10  ;;  %v543_v14 = vadd.f32 1.0, %v1349_v12 }
 0x133   : > { %1182 = vmatprep.mubr.msk.f32.mxu1 %vm1443_vm0, %v1444_v6 }
 0x134   : > { %v556_v2 = vmul.f32 %v543_v14, %v452_v13 }
 0x136   : > { %1183 = vmatmul.mubr.f32.gmra.mrb[18].mxu1 %v556_v2 }
 0x1d9   : > { %v646_v16 = vpop.f32.mrb[26].mxu0 }
 0x1da   : > { %v647_v17 = vadd.f32 %v1007_v15, %v646_v16  ;;  %v1148_v18 = vpop.f32.mrb[27].mxu0 }
 0x1dc   : > { %710 = vst.msk [vmem:[%s1748_s20] sm:$0xff] %vm270_vm1, %v647_v17 }
 0x1dd   : > { %v651_v6 = vpop.f32.mrb[28].mxu0 }
 0x1de   : > { %v652_v20 = vadd.f32 %v1007_v15, %v651_v6  ;;  %v1151_v21 = vpop.f32.mrb[29].mxu0 }
 0x1e0   : > { %711 = vst.msk [vmem:[%s1748_s20 + $0x8] sm:$0xff] %vm270_vm1, %v652_v20 }
 0x1e1   : > { %v656_v22 = vpop.f32.mrb[30].mxu0 }
 0x1e2   : > { %v657_v23 = vadd.f32 %v1007_v15, %v656_v22  ;;  %v1154_v24 = vpop.f32.mrb[31].mxu0 }
 0x1e4   : > { %712 = vst.msk [vmem:[%s1748_s20 + $0x10] sm:$0xff] %vm270_vm1, %v657_v23 }
 0x1e5   : > { %v661_v11 = vpop.f32.mrb[0].mxu1 }
 0x1e6   : > { %v662_v25 = vadd.f32 %v1007_v15, %v661_v11  ;;  %v1157_v26 = vpop.f32.mrb[1].mxu1 }
 0x1e8   : > { %713 = vst.msk [vmem:[%s1748_s20 + $0x18] sm:$0xff] %vm270_vm1, %v662_v25 }
 0x1e9   : > { %v666_v27 = vpop.f32.mrb[2].mxu1 }
 0x1ea   : > { %v667_v28 = vadd.f32 %v1007_v15, %v666_v27  ;;  %v1160_v29 = vpop.f32.mrb[3].mxu1 }
 0x1ec   : > { %714 = vst.msk [vmem:[%s1748_s20 + $0x20] sm:$0xff] %vm270_vm1, %v667_v28 }
 0x1ed   : > { %v671_v31 = vpop.f32.mrb[4].mxu1 }
 0x1ee   : > { %v672_v32 = vadd.f32 %v1007_v15, %v671_v31  ;;  %v1163_v33 = vpop.f32.mrb[5].mxu1 }
 0x1f0   : > { %715 = vst.msk [vmem:[%s1748_s20 + $0x28] sm:$0xff] %vm270_vm1, %v672_v32 }
 0x1f1   : > { %v676_v34 = vpop.f32.mrb[6].mxu1 }
 0x1f2   : > { %v677_v35 = vadd.f32 %v1007_v15, %v676_v34  ;;  %v1166_v36 = vpop.f32.mrb[7].mxu1 }
 0x1f4   : > { %716 = vst.msk [vmem:[%s1748_s20 + $0x30] sm:$0xff] %vm270_vm1, %v677_v35 }
 0x1f5   : > { %v681_v37 = vpop.f32.mrb[8].mxu1 }
 0x1f6   : > { %v682_v38 = vadd.f32 %v1007_v15, %v681_v37  ;;  %v1169_v19 = vpop.f32.mrb[9].mxu1 }
 0x1f8   : > { %717 = vst.msk [vmem:[%s1748_s20 + $0x38] sm:$0xff] %vm270_vm1, %v682_v38 }
 0x1f9   : > { %v686_v39 = vpop.f32.mrb[10].mxu1 }
 0x1fa   : > { %v687_v40 = vadd.f32 %v1007_v15, %v686_v39  ;;  %v1172_v41 = vpop.f32.mrb[11].mxu1 }
 0x1fc   : > { %718 = vst.msk [vmem:[%s1748_s20 + $0x40] sm:$0xff] %vm270_vm1, %v687_v40 }
 0x1fd   : > { %v691_v43 = vpop.f32.mrb[12].mxu1 }
 0x1fe   : > { %v692_v44 = vadd.f32 %v1007_v15, %v691_v43  ;;  %v1175_v46 = vpop.f32.mrb[13].mxu1 }
 0x200   : > { %719 = vst.msk [vmem:[%s1748_s20 + $0x48] sm:$0xff] %vm270_vm1, %v692_v44 }
 0x201   : > { %v696_v47 = vpop.f32.mrb[14].mxu1 }
 0x202   : > { %v697_v48 = vadd.f32 %v1007_v15, %v696_v47  ;;  %v1178_v49 = vpop.f32.mrb[15].mxu1 }
 0x204   : > { %720 = vst.msk [vmem:[%s1748_s20 + $0x50] sm:$0xff] %vm270_vm1, %v697_v48 }
 0x205   : > { %v701_v50 = vpop.f32.mrb[16].mxu1 }
 0x206   : > { %v702_v51 = vadd.f32 %v1007_v15, %v701_v50  ;;  %v1181_v30 = vpop.f32.mrb[17].mxu1  ;;  %729 = sbr.rel (!%p1500_p4) target bundleno = 586 (0x24a), region = 44 }
 0x208   : > { %721 = vst.msk [vmem:[%s1748_s20 + $0x58] sm:$0xff] %vm270_vm1, %v702_v51 }
 0x209   : > { %v706_v52 = vpop.f32.mrb[18].mxu1 }
 0x20a   : > { %v707_v45 = vadd.f32 %v1007_v15, %v706_v52  ;;  %v1184_v53 = vpop.f32.mrb[19].mxu1 }
 0x20c   : > { %722 = vst.msk [vmem:[%s1748_s20 + $0x60] sm:$0xff] %vm270_vm1, %v707_v45 }
 0x20d   : > { %s1879_s18 = smov (!%p732_p8, %s731_s18), 13 }
 0x20e   : > { %s1008_s29 = sshll.u32 %s1879_s18, 7 }
 0x20f   : > { %p1011_p9 = scmp.eq.s32.totalorder %s1008_s29, 0 }
 0x210   : > { %1350 = sdivrem.u32 (!%p1011_p9), %s1879_s18, 13 }
 0x211   : > { %740 = sbr.rel (%p1011_p9) target bundleno = 586 (0x24a), region = 48 }
 0x219   : > { %s1789_s26 = spop.drf %1350 }
 0x21a   : > { %p1012_p10 = scmp.le.s32.totalorder %s1789_s26, 0 }
 0x21b   : > { %s1872_s21 = smov (!%p1012_p10), %s1783_s28  ;;  %s1873_s10 = smov (!%p1012_p10), %s1748_s20 }
 0x21c   : > { %944 = sbr.rel (%p1012_p10) target bundleno = 557 (0x22d), region = 124  ;;  %s1798_s30 = smov (!%p1012_p10), 0  }
 0x21d   : > { %s1800_s6 = smov (!%p1012_p10), 0  }
 0x223 LB: >> { %v828_v54 = vld [vmem:[%s1416_s10] sm:$0xff]  ;;  %v830_v56 = vld [vmem:[%s1416_s10 + $0x8] sm:$0xff]  ;;  %v832_v57 = vld [vmem:[%s1416_s10 + $0x10] sm:$0xff]  ;;  %s854_s7 = sadd.s32 1, %s1420_s30  ;;  %s822_s6 = sadd.s32 1, %s1424_s6   ;;  %s1424_s6 = sphi %s1800_s6, %s822_s6   ;;  %s1420_s30 = sphi %s1798_s30, %s1874_s30   ;;  %s1416_s10 = sphi %s1873_s10, %s859_s10   ;;  %s1412_s21 = sphi %s1872_s21, %s860_s21  }
 0x224   : >> { %829 = vst [vmem:[%s1412_s21] sm:$0xff] %v828_v54  ;;  %831 = vst [vmem:[%s1412_s21 + $0x8] sm:$0xff] %v830_v56  ;;  %v834_v58 = vld [vmem:[%s1416_s10 + $0x18] sm:$0xff]  ;;  %v836_v60 = vld [vmem:[%s1416_s10 + $0x20] sm:$0xff]  ;;  %p855_p11 = scmp.ge.s32.totalorder %s854_s7, %s1789_s26  ;;  %p821_p12 = scmp.ge.s32.totalorder %s822_s6, %s1789_s26 }
 0x225   : >> { %833 = vst [vmem:[%s1412_s21 + $0x10] sm:$0xff] %v832_v57  ;;  %v838_v42 = vld [vmem:[%s1416_s10 + $0x28] sm:$0xff]  ;;  %835 = vst [vmem:[%s1412_s21 + $0x18] sm:$0xff] %v834_v58  ;;  %v840_v61 = vld [vmem:[%s1416_s10 + $0x30] sm:$0xff] }
 0x226   : >> { %837 = vst [vmem:[%s1412_s21 + $0x20] sm:$0xff] %v836_v60  ;;  %839 = vst [vmem:[%s1412_s21 + $0x28] sm:$0xff] %v838_v42  ;;  %v842_v62 = vld [vmem:[%s1416_s10 + $0x38] sm:$0xff]  ;;  %v844_v59 = vld [vmem:[%s1416_s10 + $0x40] sm:$0xff]  ;;  %s1881_s7 = smov (%p855_p11, %s854_s7), 0  ;;  %824 = sbr.rel (!%p821_p12) target bundleno = 547 (0x223), region = 130 }
 0x227   : >> { %841 = vst [vmem:[%s1412_s21 + $0x30] sm:$0xff] %v840_v61  ;;  %843 = vst [vmem:[%s1412_s21 + $0x38] sm:$0xff] %v842_v62  ;;  %v846_v63 = vld [vmem:[%s1416_s10 + $0x48] sm:$0xff]  ;;  %v848_v0 = vld [vmem:[%s1416_s10 + $0x50] sm:$0xff]  ;;  %s857_s8 = smul.u32 104, %s1881_s7  ;;  %s1874_s30 = smov %s1881_s7 }
 0x228   : >> { %845 = vst [vmem:[%s1412_s21 + $0x40] sm:$0xff] %v844_v59  ;;  %v850_v1 = vld [vmem:[%s1416_s10 + $0x58] sm:$0xff]  ;;  %847 = vst [vmem:[%s1412_s21 + $0x48] sm:$0xff] %v846_v63  ;;  %v852_v3 = vld [vmem:[%s1416_s10 + $0x60] sm:$0xff] }
 0x229   : >> { %849 = vst [vmem:[%s1412_s21 + $0x50] sm:$0xff] %v848_v0  ;;  %851 = vst [vmem:[%s1412_s21 + $0x58] sm:$0xff] %v850_v1  ;;  %s859_s10 = scalar_lea.vmem %s1748_s20, %s857_s8 [#allocation2]  }
 0x22a   : >> { %853 = vst [vmem:[%s1412_s21 + $0x60] sm:$0xff] %v852_v3  ;;  %s860_s21 = scalar_lea.vmem %s1783_s28, %s857_s8  }
 0x22d PF: > { %1352 = sdivrem.u32 %s1879_s18, 13 }
 0x22e   : > { %s1013_s9 = smul.u32 104, %s1789_s26 }
 0x230   : > { %s865_s11 = scalar_lea.vmem %s1748_s20, %s1013_s9 [#allocation2]   ;;  %s867_s12 = scalar_lea.vmem %s1783_s28, %s1013_s9  }
 0x236   : > { %s1353_s13 = spop.drf %1352 }
 0x237   : > { %p1015_p13 = scmp.le.s32.totalorder %s1353_s13, 0 }
 0x238   : > { %s1426_s14 = smov (!%p1015_p13), %s867_s12   ;;  %s1430_s15 = smov (!%p1015_p13), %s865_s11  }
 0x239   : > { %958 = sbr.rel (%p1015_p13) target bundleno = 586 (0x24a), region = 135  ;;  %s1434_s16 = smov (!%p1015_p13), 0  }
 0x23a   : > { %s1438_s17 = smov (!%p1015_p13), 0  }
 0x240 LB: >> { %v877_v55 = vld [vmem:[%s1432_s15] sm:$0xff]  ;;  %s879_s23 = sadd.s32 1, %s1436_s16  ;;  %s871_s17 = sadd.s32 1, %s1440_s17   ;;  %s1440_s17 = sphi %s1438_s17, %s871_s17   ;;  %s1436_s16 = sphi %s1434_s16, %s1435_s16   ;;  %s1432_s15 = sphi %s1430_s15, %s884_s15   ;;  %s1428_s14 = sphi %s1426_s14, %s885_s14  }
 0x241   : >> { %878 = vst [vmem:[%s1428_s14] sm:$0xff] %v877_v55  ;;  %p880_p0 = scmp.ge.s32.totalorder %s879_s23, %s1353_s13  ;;  %p870_p1 = scmp.ge.s32.totalorder %s871_s17, %s1353_s13 }
 0x243   : >> { %s1883_s23 = smov (%p880_p0, %s879_s23), 0  ;;  %873 = sbr.rel (!%p870_p1) target bundleno = 576 (0x240), region = 141 }
 0x244   : >> { %s1016_s20 = sshll.u32 %s1883_s23, 3  ;;  %s1435_s16 = smov %s1883_s23  }
 0x245   : >> { %s884_s15 = scalar_lea.vmem %s865_s11, %s1016_s20 [#allocation2]   ;;  %s885_s14 = scalar_lea.vmem %s867_s12, %s1016_s20  }
 0x24a PF: > { %p12_p2 = scmp.ge.s32.totalorder %s1490_s22, 4   ;;  %s1875_s18 = smov %s1404_s19 }
 0x24b   : > { %s1876_s19 = smov %s1498_s25  ;;  %s1877_s20 = smov %s1490_s22 }
 0x24c   :  { %14 = sbr.rel (!%p12_p2) target bundleno = 2 (0x2), region = 152 }

</bundles_post_ra>
